<compile_context>
chip_gen: v6e
topology: v6e:2x2x1
jax: 0.10.0
libtpu: 0.0.40
codegen_flags: <defaults>
</compile_context>

<pallas_src>
import functools

import jax
import jax.numpy as jnp
from jax.experimental import pallas as pl
from jax.experimental.pallas import tpu as pltpu

LN_EPS = 1e-5  # torch.nn.LayerNorm default


def _round_up(a, m):
    return (a + m - 1) // m * m


def _cdiv(a, b):
    return (a + b - 1) // b


def _layer_norm(x, gamma, beta, n_true):
    # One-pass stats over the padded width.  Pad lanes are exactly 0 (zero
    # weight cols / bias), so sums over the padded width equal sums over the
    # true features; dividing by the TRUE count gives the exact LN statistics.
    inv_n = 1.0 / float(n_true)
    s = jnp.sum(x, axis=-1, keepdims=True)
    ss = jnp.sum(jnp.square(x), axis=-1, keepdims=True)
    mean = s * inv_n
    var = jnp.maximum(ss * inv_n - jnp.square(mean), 0.0)
    # gamma/beta are 0 on pad lanes -> pad lanes stay exactly 0 after LN.
    return (x - mean) * jax.lax.rsqrt(var + LN_EPS) * gamma + beta


def actor_kernel(
    x_ref,            # (tile, num_inputs)   bf16
    w1_ref, p1_ref,   # (ni, H1p) bf16, (3, H1p) f32  [bias, gamma, beta]
    w2_ref, p2_ref,   # (H1p, H2p) bf16, (3, H2p) f32
    w3_ref, b3_ref,   # (H2p, Ap) bf16, (1, Ap) f32
    out_ref,          # (tile, Ap) f32
    *, h1_true, h2_true,
):
    x = x_ref[...]                                     # already bf16

    # fc1 + LayerNorm + ReLU
    p1 = p1_ref[...]
    h = jnp.dot(x, w1_ref[...], preferred_element_type=jnp.float32) + p1[0:1, :]
    h = jnp.maximum(_layer_norm(h, p1[1:2, :], p1[2:3, :], h1_true), 0.0)

    # fc2 + LayerNorm + ReLU
    p2 = p2_ref[...]
    h = jnp.dot(h.astype(jnp.bfloat16), w2_ref[...],
                preferred_element_type=jnp.float32) + p2[0:1, :]
    h = jnp.maximum(_layer_norm(h, p2[1:2, :], p2[2:3, :], h2_true), 0.0)

    # out + tanh  (pad output lanes are exactly 0 -> tanh(0)=0, sliced off later)
    o = jnp.dot(h.astype(jnp.bfloat16), w3_ref[...],
                preferred_element_type=jnp.float32) + b3_ref[...]
    out_ref[...] = jnp.tanh(o).astype(out_ref.dtype)


def actor_forward(x, params, *, batch_tile=1024):
    """x: (B, num_inputs) float32. params: dict from init_actor_params."""
    num_inputs, h1, h2, num_actions = params["dims"]
    B = x.shape[0]
    h1p = params["w1"].shape[1]
    h2p = params["w2"].shape[1]
    ap = params["w3"].shape[1]

    # Balanced batch tiling: pad waste < one 8-row group; force >= 2 grid steps
    # for larger batches so both v7x TensorCores are used.
    n_steps = max(1, _cdiv(B, batch_tile))
    if n_steps == 1 and B >= 256:
        n_steps = 2
    tile = _round_up(_cdiv(B, n_steps), 8)
    Bp = tile * n_steps

    xb = x.astype(jnp.bfloat16)
    if Bp != B:
        xb = jnp.pad(xb, ((0, Bp - B), (0, 0)))

    kernel = functools.partial(actor_kernel, h1_true=h1, h2_true=h2)

    def rep2(shape):
        return pl.BlockSpec(shape, lambda i: (0, 0))

    weight_bytes = sum(
        params[k].size * params[k].dtype.itemsize
        for k in ("w1", "p1", "w2", "p2", "w3", "b3")
    )
    cost = pl.CostEstimate(
        flops=2 * Bp * (num_inputs * h1p + h1p * h2p + h2p * ap),
        transcendentals=Bp * (2 + ap),                 # 2 rsqrt + tanh per row
        bytes_accessed=weight_bytes + Bp * num_inputs * 2 + Bp * ap * 4,
    )

    out = pl.pallas_call(
        kernel,
        out_shape=jax.ShapeDtypeStruct((Bp, ap), jnp.float32),
        grid_spec=pltpu.PrefetchScalarGridSpec(
            num_scalar_prefetch=0,
            grid=(n_steps,),
            in_specs=[
                pl.BlockSpec((tile, num_inputs), lambda i: (i, 0)),
                rep2((num_inputs, h1p)), rep2((3, h1p)),
                rep2((h1p, h2p)), rep2((3, h2p)),
                rep2((h2p, ap)), rep2((1, ap)),
            ],
            out_specs=pl.BlockSpec((tile, ap), lambda i: (i, 0)),
        ),
        compiler_params=pltpu.CompilerParams(
            dimension_semantics=("parallel",),
        ),
        cost_estimate=cost,
    )(xb, params["w1"], params["p1"], params["w2"], params["p2"],
      params["w3"], params["b3"])

    return out[:B, :num_actions]


def init_actor_params(key, num_inputs, num_actions,
                      uniform_init=(0.003, 0.0003), hidden_sizes=(400, 300)):
    """Deterministic init mirroring the PyTorch module, in padded/packed layout.

    Weights are generated in (in, out) layout (kernel computes x @ W + b ==
    PyTorch x @ weight.T + bias), padded to lane multiples with zeros, and
    stored in bf16.  bias/gamma/beta are packed per layer into a (3, Hp) f32
    array with zeros on pad lanes.
    """
    h1, h2 = hidden_sizes
    h1p = _round_up(h1, 128)
    h2p = _round_up(h2, 128)
    ap = _round_up(num_actions, 128)
    k = jax.random.split(key, 6)

    def fanin_uniform(kk, shape, fan_in):
        w = 1.0 / jnp.sqrt(fan_in)
        return jax.random.uniform(kk, shape, jnp.float32, -w, w)

    w1 = fanin_uniform(k[0], (num_inputs, h1), num_inputs)
    b1 = fanin_uniform(k[1], (h1,), h1)
    w2 = fanin_uniform(k[2], (h1, h2), h1)
    b2 = fanin_uniform(k[3], (h2,), h2)
    w3 = jax.random.uniform(k[4], (h2, num_actions), jnp.float32,
                            -uniform_init[0], uniform_init[0])
    b3 = jax.random.uniform(k[5], (num_actions,), jnp.float32,
                            -uniform_init[1], uniform_init[1])

    def pad2(a, rows, cols):
        return jnp.pad(a, ((0, rows - a.shape[0]), (0, cols - a.shape[1])))

    def pad1(a, n):
        return jnp.pad(a, (0, n - a.shape[0]))

    def pack(bias, h_true, h_pad):
        return jnp.stack([
            pad1(bias, h_pad),                          # row 0: bias
            pad1(jnp.ones((h_true,), jnp.float32), h_pad),   # row 1: gamma
            jnp.zeros((h_pad,), jnp.float32),           # row 2: beta
        ])

    return {
        "w1": pad2(w1, num_inputs, h1p).astype(jnp.bfloat16),
        "p1": pack(b1, h1, h1p),
        "w2": pad2(w2, h1p, h2p).astype(jnp.bfloat16),
        "p2": pack(b2, h2, h2p),
        "w3": pad2(w3, h2p, ap).astype(jnp.bfloat16),
        "b3": pad1(b3, ap).reshape(1, ap),
        "dims": (num_inputs, h1, h2, num_actions),
    }


def actor_reference(x, params):
    """Pure-JAX reference on the TRUE (unpadded) weights, torch-style LayerNorm,
    same bf16-input / f32-accumulate matmul numerics as the kernel."""
    num_inputs, h1, h2, a = params["dims"]
    w1 = params["w1"][:num_inputs, :h1]
    b1, g1, be1 = (params["p1"][i, :h1] for i in range(3))
    w2 = params["w2"][:h1, :h2]
    b2, g2, be2 = (params["p2"][i, :h2] for i in range(3))
    w3 = params["w3"][:h2, :a]
    b3 = params["b3"][0, :a]

    def mm(v, w):
        return jnp.dot(v.astype(jnp.bfloat16), w, preferred_element_type=jnp.float32)

    def ln(v, g, b):
        mean = jnp.mean(v, axis=-1, keepdims=True)
        var = jnp.mean(jnp.square(v - mean), axis=-1, keepdims=True)
        return (v - mean) * jax.lax.rsqrt(var + LN_EPS) * g + b

    h = jnp.maximum(ln(mm(x, w1) + b1, g1, be1), 0.0)
    h = jnp.maximum(ln(mm(h, w2) + b2, g2, be2), 0.0)
    return jnp.tanh(mm(h, w3) + b3)


if __name__ == "__main__":
    key = jax.random.PRNGKey(0)
    k_param, k_x = jax.random.split(key)

    # Small demo shapes; B deliberately NOT a multiple of 8 to exercise padding.
    B, NUM_INPUTS, NUM_ACTIONS = 10, 32, 8
    HIDDEN = (400, 300)   # module defaults -> padded to (512, 384) internally

    params = init_actor_params(k_param, NUM_INPUTS, NUM_ACTIONS,
                               hidden_sizes=HIDDEN)
    x = jax.random.normal(k_x, (B, NUM_INPUTS), jnp.float32)

    out = actor_forward(x, params)
    out = jax.block_until_ready(out)

    ref = actor_reference(x, params)
    assert out.shape == (B, NUM_ACTIONS), out.shape
    assert jnp.allclose(out, ref, atol=2e-3, rtol=2e-3), (
        float(jnp.max(jnp.abs(out - ref))))

    print("KERNEL_OK")
</pallas_src>

<mosaic_0001>
module attributes {stable_mosaic.version = 11 : i64} {
  func.func @actor_kernel(%arg0: i32, %arg1: memref<16x32xbf16, #tpu.memory_space<vmem>>, %arg2: memref<32x512xbf16, #tpu.memory_space<vmem>>, %arg3: memref<3x512xf32, #tpu.memory_space<vmem>>, %arg4: memref<512x384xbf16, #tpu.memory_space<vmem>>, %arg5: memref<3x384xf32, #tpu.memory_space<vmem>>, %arg6: memref<384x128xbf16, #tpu.memory_space<vmem>>, %arg7: memref<1x128xf32, #tpu.memory_space<vmem>>, %arg8: memref<16x128xf32, #tpu.memory_space<vmem>>) attributes {dimension_semantics = [#tpu.dimension_semantics<parallel>], iteration_bounds = array<i64: 1>, scalar_prefetch = 0 : i64, scratch_operands = 0 : i64, tpu.core_type = #tpu.core_type<tc>, window_params = [{transform_indices = @transform_0, window_bounds = array<i64: 16, 32>}, {pipeline_mode = #tpu.pipeline_mode<synchronous>, transform_indices = @transform_1, window_bounds = array<i64: 32, 512>}, {pipeline_mode = #tpu.pipeline_mode<synchronous>, transform_indices = @transform_2, window_bounds = array<i64: 3, 512>}, {pipeline_mode = #tpu.pipeline_mode<synchronous>, transform_indices = @transform_3, window_bounds = array<i64: 512, 384>}, {pipeline_mode = #tpu.pipeline_mode<synchronous>, transform_indices = @transform_4, window_bounds = array<i64: 3, 384>}, {pipeline_mode = #tpu.pipeline_mode<synchronous>, transform_indices = @transform_5, window_bounds = array<i64: 384, 128>}, {pipeline_mode = #tpu.pipeline_mode<synchronous>, transform_indices = @transform_6, window_bounds = array<i64: 1, 128>}, {transform_indices = @transform_7, window_bounds = array<i64: 16, 128>}]} {
    %c0 = arith.constant 0 : index
    %c0_0 = arith.constant 0 : index
    %0 = vector.load %arg1[%c0, %c0_0] : memref<16x32xbf16, #tpu.memory_space<vmem>>, vector<16x32xbf16>
    %c0_1 = arith.constant 0 : index
    %c0_2 = arith.constant 0 : index
    %1 = vector.load %arg3[%c0_1, %c0_2] : memref<3x512xf32, #tpu.memory_space<vmem>>, vector<3x512xf32>
    %c0_3 = arith.constant 0 : index
    %c0_4 = arith.constant 0 : index
    %2 = vector.load %arg2[%c0_3, %c0_4] : memref<32x512xbf16, #tpu.memory_space<vmem>>, vector<32x512xbf16>
    %cst = arith.constant dense<0.000000e+00> : vector<16x512xf32>
    %3 = tpu.matmul %0, %2, %cst {dimension_numbers = #tpu.dot_dimension_numbers<[1], [0], [0], [1], [0, 0, 1, 1], [], []>} : vector<16x32xbf16>, vector<32x512xbf16>, vector<16x512xf32> -> vector<16x512xf32>
    %4 = vector.extract_strided_slice %1 {offsets = [0, 0], sizes = [1, 512], strides = [1, 1]} : vector<3x512xf32> to vector<1x512xf32>
    %5 = vector.broadcast %4 : vector<1x512xf32> to vector<16x512xf32>
    %6 = arith.addf %3, %5 : vector<16x512xf32>
    %7 = vector.extract_strided_slice %1 {offsets = [1, 0], sizes = [1, 512], strides = [1, 1]} : vector<3x512xf32> to vector<1x512xf32>
    %8 = vector.extract_strided_slice %1 {offsets = [2, 0], sizes = [1, 512], strides = [1, 1]} : vector<3x512xf32> to vector<1x512xf32>
    %cst_5 = arith.constant dense<0.000000e+00> : vector<16xf32>
    %9 = vector.multi_reduction <add>, %6, %cst_5 [1] : vector<16x512xf32> to vector<16xf32>
    %10 = vector.shape_cast %9 : vector<16xf32> to vector<16x1xf32>
    %11 = arith.mulf %6, %6 : vector<16x512xf32>
    %cst_6 = arith.constant dense<0.000000e+00> : vector<16xf32>
    %12 = vector.multi_reduction <add>, %11, %cst_6 [1] : vector<16x512xf32> to vector<16xf32>
    %13 = vector.shape_cast %12 : vector<16xf32> to vector<16x1xf32>
    %cst_7 = arith.constant 2.500000e-03 : f32
    %14 = vector.broadcast %cst_7 : f32 to vector<16x1xf32>
    %15 = arith.mulf %10, %14 : vector<16x1xf32>
    %cst_8 = arith.constant 2.500000e-03 : f32
    %16 = vector.broadcast %cst_8 : f32 to vector<16x1xf32>
    %17 = arith.mulf %13, %16 : vector<16x1xf32>
    %18 = arith.mulf %15, %15 : vector<16x1xf32>
    %19 = arith.subf %17, %18 : vector<16x1xf32>
    %cst_9 = arith.constant 0.000000e+00 : f32
    %20 = vector.broadcast %cst_9 : f32 to vector<16x1xf32>
    %21 = arith.maximumf %19, %20 : vector<16x1xf32>
    %22 = vector.broadcast %15 : vector<16x1xf32> to vector<16x512xf32>
    %23 = arith.subf %6, %22 : vector<16x512xf32>
    %cst_10 = arith.constant 9.99999974E-6 : f32
    %24 = vector.broadcast %cst_10 : f32 to vector<16x1xf32>
    %25 = arith.addf %21, %24 : vector<16x1xf32>
    %26 = math.rsqrt %25 : vector<16x1xf32>
    %27 = vector.broadcast %26 : vector<16x1xf32> to vector<16x512xf32>
    %28 = arith.mulf %23, %27 : vector<16x512xf32>
    %29 = vector.broadcast %7 : vector<1x512xf32> to vector<16x512xf32>
    %30 = arith.mulf %28, %29 : vector<16x512xf32>
    %31 = vector.broadcast %8 : vector<1x512xf32> to vector<16x512xf32>
    %32 = arith.addf %30, %31 : vector<16x512xf32>
    %cst_11 = arith.constant 0.000000e+00 : f32
    %33 = vector.broadcast %cst_11 : f32 to vector<16x512xf32>
    %34 = arith.maximumf %32, %33 : vector<16x512xf32>
    %c0_12 = arith.constant 0 : index
    %c0_13 = arith.constant 0 : index
    %35 = vector.load %arg5[%c0_12, %c0_13] : memref<3x384xf32, #tpu.memory_space<vmem>>, vector<3x384xf32>
    %36 = arith.truncf %34 : vector<16x512xf32> to vector<16x512xbf16>
    %c0_14 = arith.constant 0 : index
    %c0_15 = arith.constant 0 : index
    %37 = vector.load %arg4[%c0_14, %c0_15] : memref<512x384xbf16, #tpu.memory_space<vmem>>, vector<512x384xbf16>
    %cst_16 = arith.constant dense<0.000000e+00> : vector<16x384xf32>
    %38 = tpu.matmul %36, %37, %cst_16 {dimension_numbers = #tpu.dot_dimension_numbers<[1], [0], [0], [1], [0, 0, 1, 1], [], []>} : vector<16x512xbf16>, vector<512x384xbf16>, vector<16x384xf32> -> vector<16x384xf32>
    %39 = vector.extract_strided_slice %35 {offsets = [0, 0], sizes = [1, 384], strides = [1, 1]} : vector<3x384xf32> to vector<1x384xf32>
    %40 = vector.broadcast %39 : vector<1x384xf32> to vector<16x384xf32>
    %41 = arith.addf %38, %40 : vector<16x384xf32>
    %42 = vector.extract_strided_slice %35 {offsets = [1, 0], sizes = [1, 384], strides = [1, 1]} : vector<3x384xf32> to vector<1x384xf32>
    %43 = vector.extract_strided_slice %35 {offsets = [2, 0], sizes = [1, 384], strides = [1, 1]} : vector<3x384xf32> to vector<1x384xf32>
    %cst_17 = arith.constant dense<0.000000e+00> : vector<16xf32>
    %44 = vector.multi_reduction <add>, %41, %cst_17 [1] : vector<16x384xf32> to vector<16xf32>
    %45 = vector.shape_cast %44 : vector<16xf32> to vector<16x1xf32>
    %46 = arith.mulf %41, %41 : vector<16x384xf32>
    %cst_18 = arith.constant dense<0.000000e+00> : vector<16xf32>
    %47 = vector.multi_reduction <add>, %46, %cst_18 [1] : vector<16x384xf32> to vector<16xf32>
    %48 = vector.shape_cast %47 : vector<16xf32> to vector<16x1xf32>
    %cst_19 = arith.constant 0.00333333341 : f32
    %49 = vector.broadcast %cst_19 : f32 to vector<16x1xf32>
    %50 = arith.mulf %45, %49 : vector<16x1xf32>
    %cst_20 = arith.constant 0.00333333341 : f32
    %51 = vector.broadcast %cst_20 : f32 to vector<16x1xf32>
    %52 = arith.mulf %48, %51 : vector<16x1xf32>
    %53 = arith.mulf %50, %50 : vector<16x1xf32>
    %54 = arith.subf %52, %53 : vector<16x1xf32>
    %cst_21 = arith.constant 0.000000e+00 : f32
    %55 = vector.broadcast %cst_21 : f32 to vector<16x1xf32>
    %56 = arith.maximumf %54, %55 : vector<16x1xf32>
    %57 = vector.broadcast %50 : vector<16x1xf32> to vector<16x384xf32>
    %58 = arith.subf %41, %57 : vector<16x384xf32>
    %cst_22 = arith.constant 9.99999974E-6 : f32
    %59 = vector.broadcast %cst_22 : f32 to vector<16x1xf32>
    %60 = arith.addf %56, %59 : vector<16x1xf32>
    %61 = math.rsqrt %60 : vector<16x1xf32>
    %62 = vector.broadcast %61 : vector<16x1xf32> to vector<16x384xf32>
    %63 = arith.mulf %58, %62 : vector<16x384xf32>
    %64 = vector.broadcast %42 : vector<1x384xf32> to vector<16x384xf32>
    %65 = arith.mulf %63, %64 : vector<16x384xf32>
    %66 = vector.broadcast %43 : vector<1x384xf32> to vector<16x384xf32>
    %67 = arith.addf %65, %66 : vector<16x384xf32>
    %cst_23 = arith.constant 0.000000e+00 : f32
    %68 = vector.broadcast %cst_23 : f32 to vector<16x384xf32>
    %69 = arith.maximumf %67, %68 : vector<16x384xf32>
    %70 = arith.truncf %69 : vector<16x384xf32> to vector<16x384xbf16>
    %c0_24 = arith.constant 0 : index
    %c0_25 = arith.constant 0 : index
    %71 = vector.load %arg6[%c0_24, %c0_25] : memref<384x128xbf16, #tpu.memory_space<vmem>>, vector<384x128xbf16>
    %cst_26 = arith.constant dense<0.000000e+00> : vector<16x128xf32>
    %72 = tpu.matmul %70, %71, %cst_26 {dimension_numbers = #tpu.dot_dimension_numbers<[1], [0], [0], [1], [0, 0, 1, 1], [], []>} : vector<16x384xbf16>, vector<384x128xbf16>, vector<16x128xf32> -> vector<16x128xf32>
    %c0_27 = arith.constant 0 : index
    %c0_28 = arith.constant 0 : index
    %73 = vector.load %arg7[%c0_27, %c0_28] : memref<1x128xf32, #tpu.memory_space<vmem>>, vector<1x128xf32>
    %74 = vector.broadcast %73 : vector<1x128xf32> to vector<16x128xf32>
    %75 = arith.addf %72, %74 : vector<16x128xf32>
    %76 = math.tanh %75 : vector<16x128xf32>
    %c0_29 = arith.constant 0 : index
    %c0_30 = arith.constant 0 : index
    %77 = vector.load %arg8[%c0_29, %c0_30] : memref<16x128xf32, #tpu.memory_space<vmem>>, vector<16x128xf32>
    tpu.vector_store %arg8[%c0_29, %c0_30], %76 {strides = array<i32>} : memref<16x128xf32, #tpu.memory_space<vmem>>, vector<16x128xf32>,
    return
  }
  func.func @transform_0(%arg0: i32) -> (i32, i32) {
    %c0_i32 = arith.constant 0 : i32
    %c0_i32_0 = arith.constant 0 : i32
    return %arg0, %c0_i32 : i32, i32
  }
  func.func @transform_1(%arg0: i32) -> (i32, i32) {
    %c0_i32 = arith.constant 0 : i32
    %c0_i32_0 = arith.constant 0 : i32
    %c0_i32_1 = arith.constant 0 : i32
    return %c0_i32, %c0_i32_0 : i32, i32
  }
  func.func @transform_2(%arg0: i32) -> (i32, i32) {
    %c0_i32 = arith.constant 0 : i32
    %c0_i32_0 = arith.constant 0 : i32
    %c0_i32_1 = arith.constant 0 : i32
    return %c0_i32, %c0_i32_0 : i32, i32
  }
  func.func @transform_3(%arg0: i32) -> (i32, i32) {
    %c0_i32 = arith.constant 0 : i32
    %c0_i32_0 = arith.constant 0 : i32
    %c0_i32_1 = arith.constant 0 : i32
    return %c0_i32, %c0_i32_0 : i32, i32
  }
  func.func @transform_4(%arg0: i32) -> (i32, i32) {
    %c0_i32 = arith.constant 0 : i32
    %c0_i32_0 = arith.constant 0 : i32
    %c0_i32_1 = arith.constant 0 : i32
    return %c0_i32, %c0_i32_0 : i32, i32
  }
  func.func @transform_5(%arg0: i32) -> (i32, i32) {
    %c0_i32 = arith.constant 0 : i32
    %c0_i32_0 = arith.constant 0 : i32
    %c0_i32_1 = arith.constant 0 : i32
    return %c0_i32, %c0_i32_0 : i32, i32
  }
  func.func @transform_6(%arg0: i32) -> (i32, i32) {
    %c0_i32 = arith.constant 0 : i32
    %c0_i32_0 = arith.constant 0 : i32
    %c0_i32_1 = arith.constant 0 : i32
    return %c0_i32, %c0_i32_0 : i32, i32
  }
  func.func @transform_7(%arg0: i32) -> (i32, i32) {
    %c0_i32 = arith.constant 0 : i32
    %c0_i32_0 = arith.constant 0 : i32
    return %arg0, %c0_i32 : i32, i32
  }
}

</mosaic_0001>

<bundles_post_ra>
// kernel: tpu_custom_call.1
= control target key start
LH: loop header
LB: loop body
LE: loop exit
PB: predicated region body
PF: predicated region fallthrough
CT: control target
= control target key end

     0   :  { %12 = vsyncpa [#allocation3], 0  ;;  %s2559_s0 = inlined_call_operand.hbm [shape: bf16[16,32], index: 0, kind: input, shape index: {}]   ;;  %s2560_s1 = inlined_call_operand.hbm [shape: bf16[32,512], index: 1, kind: input, shape index: {}]   ;;  %s2561_s2 = inlined_call_operand.hbm [shape: f32[3,512], index: 2, kind: input, shape index: {}]   ;;  %s2562_s3 = inlined_call_operand.hbm [shape: bf16[512,384], index: 3, kind: input, shape index: {}]   ;;  %s2563_s4 = inlined_call_operand.hbm [shape: f32[3,384], index: 4, kind: input, shape index: {}]   ;;  %s2564_s5 = inlined_call_operand.hbm [shape: bf16[384,128], index: 5, kind: input, shape index: {}]   ;;  %s2565_s6 = inlined_call_operand.vmem [shape: f32[1,128], index: 6, kind: input, shape index: {}]   ;;  %s2566_s7 = inlined_call_operand.hbm [shape: f32[16,128], index: 7, kind: output, shape index: {}]  }
   0x1   :  { %13 = vsyncpa [#allocation6], 0 }
   0x2   :  { %14 = vsyncpa [#allocation9], 0 }
   0x3   :  { %15 = vsyncpa [#allocation12], 0 }
   0x4   :  { %16 = vsyncpa [#allocation4], 0  ;;  %s2288_s24 = smov [#allocation5]  }
   0x5   :  { %s34_s25 = sshll.u32 %s2288_s24, 4  ;;  %s35_s25 = int_to_ptr.vmem [resolvable:$true] %s34_s25 }
   0x6   :  { %s2146_s26 = scalar_lea.vmem %s35_s25, 1024  ;;  %p2151_p1 = scmp.lt.s32.totalorder %s35_s25, %s35_s25 }
   0x7   :  { %p2147_p0 = scmp.ne.s32.totalorder %s35_s25, %s2146_s26  ;;  %p2152_p2 = scmp.lt.s32.totalorder %s2146_s26, %s2146_s26 }
   0x9   :  { %p2153_p3 = por %p2152_p2, %p2151_p1 }
   0xb   :  { %p2154_p4 = pnand %p2153_p3, %p2147_p0 }
   0xd   :  { %2157 = shalt.err (!%p2154_p4)
}
   0xe   :  { %s2289_s27 = smov 256   ;;  %s2290_s28 = smov 16  }
   0xf   :  { %40 = dma.hbm_to_vmem [thread:$0]  %s2560_s1, 1024, %s35_s25, [#allocation6], %s2289_s27, %s2289_s27, %s2290_s28  }
  0x10   :  { %s2291_s8 = smov [#allocation8]  }
  0x11   :  { %s56_s9 = sshll.u32 %s2291_s8, 4  ;;  %s57_s9 = int_to_ptr.vmem [resolvable:$true] %s56_s9 }
  0x12   :  { %s2166_s10 = scalar_lea.vmem %s57_s9, 12288  ;;  %p2171_p6 = scmp.lt.s32.totalorder %s57_s9, %s57_s9 }
  0x13   :  { %p2167_p5 = scmp.ne.s32.totalorder %s57_s9, %s2166_s10  ;;  %p2172_p7 = scmp.lt.s32.totalorder %s2166_s10, %s2166_s10 }
  0x15   :  { %p2173_p8 = por %p2172_p7, %p2171_p6 }
  0x17   :  { %p2174_p9 = pnand %p2173_p8, %p2167_p5 }
  0x19   :  { %2177 = shalt.err (!%p2174_p9)
}
  0x1a   :  { %s2292_s11 = smov 192   ;;  %s2293_s12 = smov 12  }
  0x1b   :  { %62 = dma.hbm_to_vmem [thread:$0]  %s2562_s3, 12288, %s57_s9, [#allocation9], %s2292_s11, %s2292_s11, %s2293_s12  }
  0x1c   :  { %s2294_s15 = smov [#allocation2]  }
  0x1d   :  { %s22_s16 = sshll.u32 %s2294_s15, 4  ;;  %s23_s16 = int_to_ptr.vmem [resolvable:$true] %s22_s16 }
  0x1e   :  { %s2186_s1 = scalar_lea.vmem %s23_s16, 128  ;;  %p2191_p11 = scmp.lt.s32.totalorder %s23_s16, %s23_s16 }
  0x1f   :  { %p2187_p10 = scmp.ne.s32.totalorder %s23_s16, %s2186_s1  ;;  %p2192_p12 = scmp.lt.s32.totalorder %s2186_s1, %s2186_s1 }
  0x21   :  { %p2193_p13 = por %p2192_p12, %p2191_p11 }
  0x23   :  { %p2194_p0 = pnand %p2193_p13, %p2187_p10 }
  0x25   :  { %2197 = shalt.err (!%p2194_p0)
}
  0x26   :  { %s2295_s17 = smov 64   ;;  %s2296_s18 = smov 4  }
  0x27   :  { %28 = dma.hbm_to_vmem [thread:$0]  %s2559_s0, 128, %s23_s16, [#allocation3], %s2295_s17, %s2295_s17, %s2296_s18  }
  0x28   :  { %s2297_s3 = smov [#allocation7]   ;;  %s2298_s22 = smov [#allocation10]  }
  0x29   :  { %s47_s21 = sshll.u32 %s2297_s3, 4  ;;  %s69_s23 = sshll.u32 %s2298_s22, 4  ;;  %s48_s21 = int_to_ptr.vmem [resolvable:$true] %s47_s21  ;;  %s70_s23 = int_to_ptr.vmem [resolvable:$true] %s69_s23 }
  0x2a   :  { %s2206_s24 = scalar_lea.vmem %s48_s21, 256  ;;  %p2211_p2 = scmp.lt.s32.totalorder %s48_s21, %s48_s21 }
  0x2b   :  { %p2207_p1 = scmp.ne.s32.totalorder %s48_s21, %s2206_s24  ;;  %p2212_p3 = scmp.lt.s32.totalorder %s2206_s24, %s2206_s24 }
  0x2d   :  { %p2213_p4 = por %p2212_p3, %p2211_p2 }
  0x2f   :  { %p2214_p5 = pnand %p2213_p4, %p2207_p1 }
  0x31   :  { %2217 = shalt.err (!%p2214_p5)
}
  0x32   :  { %50 = dma.hbm_to_vmem [thread:$0]  %s2561_s2, 256, %s48_s21, [#allocation6]  }
  0x33   :  { %s2226_s27 = scalar_lea.vmem %s70_s23, 192  ;;  %p2231_p7 = scmp.lt.s32.totalorder %s70_s23, %s70_s23 }
  0x34   :  { %p2227_p6 = scmp.ne.s32.totalorder %s70_s23, %s2226_s27  ;;  %p2232_p8 = scmp.lt.s32.totalorder %s2226_s27, %s2226_s27 }
  0x36   :  { %p2233_p9 = por %p2232_p8, %p2231_p7 }
  0x38   :  { %p2234_p10 = pnand %p2233_p9, %p2227_p6 }
  0x3a   :  { %2237 = shalt.err (!%p2234_p10)
}
  0x3b   :  { %72 = dma.hbm_to_vmem [thread:$0]  %s2563_s4, 192, %s70_s23, [#allocation9]  }
  0x3c   :  { %s2299_s29 = smov [#allocation11]  }
  0x3d   :  { %s78_s30 = sshll.u32 %s2299_s29, 4  ;;  %s79_s30 = int_to_ptr.vmem [resolvable:$true] %s78_s30 }
  0x3e   :  { %s2246_s8 = scalar_lea.vmem %s79_s30, 3072  ;;  %p2251_p12 = scmp.lt.s32.totalorder %s79_s30, %s79_s30 }
  0x3f   :  { %p2247_p11 = scmp.ne.s32.totalorder %s79_s30, %s2246_s8  ;;  %p2252_p13 = scmp.lt.s32.totalorder %s2246_s8, %s2246_s8 }
  0x41   :  { %p2253_p0 = por %p2252_p13, %p2251_p12 }
  0x43   :  { %p2254_p1 = pnand %p2253_p0, %p2247_p11 }
  0x45   :  { %2257 = shalt.err (!%p2254_p1)
}
  0x46   :  { %84 = dma.hbm_to_vmem [thread:$0]  %s2564_s5, 3072, %s79_s30, [#allocation12], %s2295_s17, %s2295_s17, %s2296_s18  }
  0x47   :  { %2278 = dma.done.wait [#allocation3], 128  }
  0x48   :  { %2279 = vsyncadd [#allocation3], 4294967168 }
  0x49   :  { %2280 = dma.done.wait [#allocation6], 1280  }
  0x4a   :  { %2281 = vsyncadd [#allocation6], 4294966016 }
  0x4b   :  { %2282 = dma.done.wait [#allocation9], 12480  }
  0x4c   :  { %2283 = vsyncadd [#allocation9], 4294954816 }
  0x4d   :  { %2284 = dma.done.wait [#allocation12], 3072  }
  0x4e   :  { %2285 = vsyncadd [#allocation12], 4294964224  ;;  %v2300_v0 = vmov 0   ;;  %v1961_v1 = vld [vmem:[#allocation5 + $0x24] ss:$16 sps:$4 sm:$0xff]   ;;  %v1973_v9 = vld [vmem:[#allocation2] sm:$0xff]   ;;  %v120_v38 = vlaneseq }
  0x4f   :  { %237 = vmatprep.mubr.bf16.mxu0 %v2300_v0  ;;  %280 = vmatprep.mubr.bf16.mxu1 %v2300_v0  ;;  %v1963_v2 = vld [vmem:[#allocation5 + $0x2c] ss:$16 sps:$4 sm:$0xff]   ;;  %v1965_v3 = vld [vmem:[#allocation5 + $0x20] ss:$16 sps:$4 sm:$0xff]   ;;  %v1966_v4 = vld [vmem:[#allocation5 + $0x28] ss:$16 sps:$4 sm:$0xff]  }
  0x50   :  { %217 = vmatprep.subr.bf16.mxu0 %v1961_v1  ;;  %260 = vmatprep.subr.bf16.mxu1 %v1963_v2  ;;  %v1967_v5 = vld [vmem:[#allocation5 + $0x4] ss:$16 sps:$4 sm:$0xff]   ;;  %v1969_v6 = vld [vmem:[#allocation5 + $0xc] ss:$16 sps:$4 sm:$0xff]   ;;  %v1971_v7 = vld [vmem:[#allocation5] ss:$16 sps:$4 sm:$0xff]  }
  0x51   :  { %218 = vmatpush1.bf16.msra.mxu0 %v1965_v3  ;;  %261 = vmatpush1.bf16.msra.mxu1 %v1966_v4  ;;  %v1972_v8 = vld [vmem:[#allocation5 + $0x8] ss:$16 sps:$4 sm:$0xff]   ;;  %vm201_vm0 = vcmask 261120   ;;  %v1982_v14 = vld [vmem:[#allocation8 + $0x94] ss:$12 sps:$4 sm:$0xff]   ;;  %v2370_v39 = vshrl.u32 %v120_v38, 7 }
  0x52   :  { %219 = vmatprep.subr.bf16.mxu0 %v1967_v5  ;;  %262 = vmatprep.subr.bf16.mxu1 %v1969_v6  ;;  %v1974_v10 = vld [vmem:[#allocation8 + $0xa8] ss:$12 sps:$4 sm:$0xff]   ;;  %v1976_v11 = vld [vmem:[#allocation8 + $0xac] ss:$12 sps:$4 sm:$0xff]   ;;  %v1980_v16 = vld [vmem:[#allocation8 + $0x90] ss:$12 sps:$4 sm:$0xff]  }
  0x53   :  { %v1977_v12 = vld [vmem:[#allocation8 + $0x228] ss:$12 sps:$4 sm:$0xff]   ;;  %v1979_v13 = vld [vmem:[#allocation8 + $0x22c] ss:$12 sps:$4 sm:$0xff]   ;;  %v1983_v17 = vld [vmem:[#allocation8 + $0x210] ss:$12 sps:$4 sm:$0xff]  }
  0x54   :  { %v1985_v15 = vld [vmem:[#allocation8 + $0x214] ss:$12 sps:$4 sm:$0xff]   ;;  %v1988_v18 = vld [vmem:[#allocation8 + $0x7c] ss:$12 sps:$4 sm:$0xff]   ;;  %v1986_v20 = vld [vmem:[#allocation8 + $0x78] ss:$12 sps:$4 sm:$0xff]  }
  0x55   :  { %220 = vmatpush1.bf16.msra.mxu0 %v1971_v7  ;;  %263 = vmatpush1.bf16.msra.mxu1 %v1972_v8  ;;  %v1991_v19 = vld [vmem:[#allocation8 + $0x1fc] ss:$12 sps:$4 sm:$0xff]   ;;  %v1989_v21 = vld [vmem:[#allocation8 + $0x1f8] ss:$12 sps:$4 sm:$0xff]   ;;  %v1992_v24 = vld [vmem:[#allocation8 + $0x60] ss:$12 sps:$4 sm:$0xff]  }
  0x56   :  { %1120 = vmatprep.subr.bf16.mxu0 %v1976_v11  ;;  %1163 = vmatprep.subr.bf16.mxu1 %v1979_v13  ;;  %v1994_v22 = vld [vmem:[#allocation8 + $0x64] ss:$12 sps:$4 sm:$0xff]   ;;  %v1995_v25 = vld [vmem:[#allocation8 + $0x1e0] ss:$12 sps:$4 sm:$0xff]   ;;  %v1998_v28 = vld [vmem:[#allocation8 + $0x48] ss:$12 sps:$4 sm:$0xff]  }
  0x57   :  { %v1997_v23 = vld [vmem:[#allocation8 + $0x1e4] ss:$12 sps:$4 sm:$0xff]   ;;  %v2000_v26 = vld [vmem:[#allocation8 + $0x4c] ss:$12 sps:$4 sm:$0xff]   ;;  %v2001_v29 = vld [vmem:[#allocation8 + $0x1c8] ss:$12 sps:$4 sm:$0xff]  }
  0x58   :  { %1725 = vmatmul.mubr.msk.bf16.vlgmr.msra.gmra.mxu0 %vm201_vm0, %v1973_v9  ;;  %1726 = vmatmul.mubr.msk.bf16.vlgmr.msra.gmra.mxu1 %vm201_vm0, %v1973_v9  ;;  %v2003_v27 = vld [vmem:[#allocation8 + $0x1cc] ss:$12 sps:$4 sm:$0xff]   ;;  %v2006_v30 = vld [vmem:[#allocation8 + $0x34] ss:$12 sps:$4 sm:$0xff]   ;;  %v2004_v32 = vld [vmem:[#allocation8 + $0x30] ss:$12 sps:$4 sm:$0xff]  }
  0x59   :  { %1121 = vmatpush1.bf16.msra.mxu0 %v1974_v10  ;;  %1164 = vmatpush1.bf16.msra.mxu1 %v1977_v12  ;;  %v2009_v31 = vld [vmem:[#allocation8 + $0x1b4] ss:$12 sps:$4 sm:$0xff]   ;;  %v2007_v33 = vld [vmem:[#allocation8 + $0x1b0] ss:$12 sps:$4 sm:$0xff]   ;;  %v2010_v36 = vld [vmem:[#allocation8 + $0x18] ss:$12 sps:$4 sm:$0xff]  }
  0x5a   :  { %1122 = vmatprep.subr.bf16.mxu0 %v1982_v14  ;;  %1165 = vmatprep.subr.bf16.mxu1 %v1985_v15  ;;  %v2012_v34 = vld [vmem:[#allocation8 + $0x1c] ss:$12 sps:$4 sm:$0xff]   ;;  %v2013_v37 = vld [vmem:[#allocation8 + $0x198] ss:$12 sps:$4 sm:$0xff]   ;;  %v2373_v40 = vsub.s32 0, %v2370_v39  ;;  %v2380_v43 = vsub.s32 4, %v2370_v39 }
  0x5b   :  { %v2015_v35 = vld [vmem:[#allocation8 + $0x19c] ss:$12 sps:$4 sm:$0xff]   ;;  %v2375_v41 = vld [vmem:[#allocation7] sm:$0x77]  ;;  %v2034_v38 = vld [vmem:[#allocation8 + $0x138] ss:$12 sps:$4 sm:$0xff]  }
  0x5c   :  { %v2377_v42 = vld [vmem:[#allocation7 + $0x8] sm:$0x77]  ;;  %v123_v44 = vrot.slane %v2375_v41, %v2373_v40  ;;  %v127_v46 = vrot.slane %v2375_v41, %v2380_v43  ;;  %vm2302_vm1 = vmmov 0   ;;  %s2303_s10 = smov [#allocation13]  }
  0x5d   :  { %1123 = vmatpush1.bf16.msra.mxu0 %v1980_v16  ;;  %1166 = vmatpush1.bf16.msra.mxu1 %v1983_v17  ;;  %v131_v45 = vrot.slane %v2377_v42, %v2373_v40  ;;  %v135_v49 = vrot.slane %v2377_v42, %v2380_v43  ;;  %s1701_s11 = sshll.u32 %s2303_s10, 4  ;;  %s1702_s11 = int_to_ptr.vmem [resolvable:$true] %s1701_s11 }
  0x5e   :  { %1124 = vmatprep.subr.bf16.mxu0 %v1988_v18  ;;  %1167 = vmatprep.subr.bf16.mxu1 %v1991_v19  ;;  %v143_v47 = vrot.slane %v123_v44, %v2373_v40  ;;  %v147_v50 = vrot.slane %v127_v46, %v2373_v40  ;;  %v2037_v44 = vld [vmem:[#allocation8 + $0x2b8] ss:$12 sps:$4 sm:$0xff]   ;;  %v2040_v46 = vld [vmem:[#allocation8 + $0x120] ss:$12 sps:$4 sm:$0xff]   ;;  %p2263_p3 = scmp.lt.s32.totalorder %s1702_s11, %s1702_s11 }
  0x5f   :  { %v151_v48 = vrot.slane %v131_v45, %v2373_v40  ;;  %v155_v56 = vrot.slane %v135_v49, %v2373_v40  ;;  %v2042_v45 = vld [vmem:[#allocation8 + $0x124] ss:$12 sps:$4 sm:$0xff]   ;;  %v2048_v49 = vld [vmem:[#allocation8 + $0x10c] ss:$12 sps:$4 sm:$0xff]  }
  0x61   :  { %1125 = vmatpush1.bf16.msra.mxu0 %v1986_v20  ;;  %1168 = vmatpush1.bf16.msra.mxu1 %v1989_v21 }
  0x62   :  { %1126 = vmatprep.subr.bf16.mxu0 %v1994_v22  ;;  %1169 = vmatprep.subr.bf16.mxu1 %v1997_v23 }
  0x65   :  { %1127 = vmatpush1.bf16.msra.mxu0 %v1992_v24  ;;  %1170 = vmatpush1.bf16.msra.mxu1 %v1995_v25  ;;  %v2018_v24 = vld [vmem:[#allocation8 + $0x4] ss:$12 sps:$4 sm:$0xff]  }
  0x66   :  { %1128 = vmatprep.subr.bf16.mxu0 %v2000_v26  ;;  %1171 = vmatprep.subr.bf16.mxu1 %v2003_v27  ;;  %v2021_v25 = vld [vmem:[#allocation8 + $0x184] ss:$12 sps:$4 sm:$0xff]   ;;  %v2016_v26 = vld [vmem:[#allocation8] ss:$12 sps:$4 sm:$0xff]  }
  0x67   :  { %v2019_v27 = vld [vmem:[#allocation8 + $0x180] ss:$12 sps:$4 sm:$0xff]  }
  0x69   :  { %1129 = vmatpush1.bf16.msra.mxu0 %v1998_v28  ;;  %1172 = vmatpush1.bf16.msra.mxu1 %v2001_v29  ;;  %v2024_v28 = vld [vmem:[#allocation8 + $0x16c] ss:$12 sps:$4 sm:$0xff]  }
  0x6a   :  { %1130 = vmatprep.subr.bf16.mxu0 %v2006_v30  ;;  %1173 = vmatprep.subr.bf16.mxu1 %v2009_v31  ;;  %v2027_v29 = vld [vmem:[#allocation8 + $0x2ec] ss:$12 sps:$4 sm:$0xff]   ;;  %v2022_v30 = vld [vmem:[#allocation8 + $0x168] ss:$12 sps:$4 sm:$0xff]  }
  0x6b   :  { %v2025_v31 = vld [vmem:[#allocation8 + $0x2e8] ss:$12 sps:$4 sm:$0xff]  }
  0x6d   :  { %1131 = vmatpush1.bf16.msra.mxu0 %v2004_v32  ;;  %1174 = vmatpush1.bf16.msra.mxu1 %v2007_v33  ;;  %v2030_v32 = vld [vmem:[#allocation8 + $0x154] ss:$12 sps:$4 sm:$0xff]  }
  0x6e   :  { %1132 = vmatprep.subr.bf16.mxu0 %v2012_v34  ;;  %1175 = vmatprep.subr.bf16.mxu1 %v2015_v35  ;;  %v2033_v33 = vld [vmem:[#allocation8 + $0x2d4] ss:$12 sps:$4 sm:$0xff]   ;;  %v2028_v34 = vld [vmem:[#allocation8 + $0x150] ss:$12 sps:$4 sm:$0xff]  }
  0x6f   :  { %v2031_v35 = vld [vmem:[#allocation8 + $0x2d0] ss:$12 sps:$4 sm:$0xff]  }
  0x71   :  { %1133 = vmatpush1.bf16.msra.mxu0 %v2010_v36  ;;  %1176 = vmatpush1.bf16.msra.mxu1 %v2013_v37  ;;  %v2036_v36 = vld [vmem:[#allocation8 + $0x13c] ss:$12 sps:$4 sm:$0xff]  }
  0x72   :  { %1134 = vmatprep.subr.bf16.mxu0 %v2018_v24  ;;  %1177 = vmatprep.subr.bf16.mxu1 %v2021_v25  ;;  %v2039_v37 = vld [vmem:[#allocation8 + $0x2bc] ss:$12 sps:$4 sm:$0xff]  }
  0x75   :  { %1135 = vmatpush1.bf16.msra.mxu0 %v2016_v26  ;;  %1178 = vmatpush1.bf16.msra.mxu1 %v2019_v27  ;;  %v2435_v26 = vsub.s32 5, %v2370_v39 }
  0x76   :  { %1136 = vmatprep.subr.bf16.mxu0 %v2024_v28  ;;  %1179 = vmatprep.subr.bf16.mxu1 %v2027_v29  ;;  %v2438_v28 = vsub.s32 1, %v2370_v39 }
  0x77   :  { %v356_v29 = vrot.slane %v2375_v41, %v2435_v26 }
  0x79   :  { %1137 = vmatpush2.bf16.msra.mxu0 %v2022_v30  ;;  %1180 = vmatpush2.bf16.msra.mxu1 %v2025_v31  ;;  %v2443_v30 = vsub.s32 6, %v2370_v39  ;;  %v364_v31 = vrot.slane %v2377_v42, %v2435_v26 }
  0x7a   :  { %1138 = vmatprep.subr.bf16.mxu0 %v2030_v32  ;;  %1181 = vmatprep.subr.bf16.mxu1 %v2033_v33  ;;  %v2448_v32 = vsub.s32 2, %v2370_v39  ;;  %v352_v33 = vrot.slane %v2375_v41, %v2438_v28 }
  0x7c   :  { %v396_v39 = vrot.slane %v2375_v41, %v2448_v32 }
  0x7d   :  { %1139 = vmatpush2.bf16.msra.mxu0 %v2028_v34  ;;  %1182 = vmatpush2.bf16.msra.mxu1 %v2031_v35  ;;  %v360_v34 = vrot.slane %v2377_v42, %v2438_v28  ;;  %v376_v35 = vrot.slane %v356_v29, %v2438_v28 }
  0x7e   :  { %1140 = vmatprep.subr.bf16.mxu0 %v2036_v36  ;;  %1183 = vmatprep.subr.bf16.mxu1 %v2039_v37  ;;  %v400_v36 = vrot.slane %v2375_v41, %v2443_v30  ;;  %v384_v37 = vrot.slane %v364_v31, %v2438_v28 }
  0x80   :  { %v420_v41 = vrot.slane %v400_v36, %v2448_v32  ;;  %v2073_v36 = vld [vmem:[#allocation8 + $0x230] ss:$12 sps:$4 sm:$0xff]  }
  0x81   :  { %1141 = vmatpush2.bf16.msra.mxu0 %v2034_v38  ;;  %1184 = vmatpush2.bf16.msra.mxu1 %v2037_v44  ;;  %v408_v38 = vrot.slane %v2377_v42, %v2443_v30  ;;  %v372_v44 = vrot.slane %v352_v33, %v2438_v28 }
  0x82   :  { %1142 = vmatprep.subr.bf16.mxu0 %v2042_v45  ;;  %v380_v45 = vrot.slane %v360_v34, %v2438_v28 }
  0x85   :  { %1143 = vmatpush2.bf16.msra.mxu0 %v2040_v46  ;;  %v404_v46 = vrot.slane %v2377_v42, %v2448_v32 }
  0x86   :  { %1144 = vmatprep.subr.bf16.mxu0 %v2048_v49 }
  0x87   :  { %v424_v42 = vrot.slane %v404_v46, %v2448_v32  ;;  %v2079_v46 = vld [vmem:[#allocation8 + $0x2c0] ss:$12 sps:$4 sm:$0xff]  }
 0x118   :  { %v239_v51 = vpop.f32.mrf.mxu0  ;;  %v282_v52 = vpop.f32.mrf.mxu1 }
 0x119   :  { %v2393_v53 = vadd.f32 %v239_v51, %v143_v47  ;;  %v2395_v54 = vadd.f32 %v282_v52, %v151_v48  ;;  %v2046_v51 = vld [vmem:[#allocation8 + $0x108] ss:$12 sps:$4 sm:$0xff]  }
 0x11a   :  { %v241_v55 = vpop.f32.mrf.mxu0  ;;  %v284_v57 = vpop.f32.mrf.mxu1  ;;  %v2049_v52 = vld [vmem:[#allocation8 + $0x288] ss:$12 sps:$4 sm:$0xff]   ;;  %1145 = vmatpush2.bf16.msra.mxu0 %v2046_v51 }
 0x11b   :  { %v2398_v58 = vadd.f32 %v241_v55, %v147_v50  ;;  %v301_v0 = vmul.f32 %v2393_v53, %v2393_v53  ;;  %v2408_v1 = vadd.f32 %v284_v57, %v155_v56  ;;  %v303_v4 = vmul.f32 %v2395_v54, %v2395_v54  ;;  %v2054_v55 = vld [vmem:[#allocation8 + $0xf4] ss:$12 sps:$4 sm:$0xff]   ;;  %v2052_v57 = vld [vmem:[#allocation8 + $0xf0] ss:$12 sps:$4 sm:$0xff]  }
 0x11c   :  { %v243_v59 = vpop.f32.mrf.mxu0  ;;  %v286_v60 = vpop.f32.mrf.mxu1  ;;  %1146 = vmatprep.subr.bf16.mxu0 %v2054_v55 }
 0x11d   :  { %v302_v61 = vmul.f32 %v2398_v58, %v2398_v58  ;;  %v2402_v62 = vadd.f32 %v243_v59, %v143_v47  ;;  %v291_v63 = vadd.f32 %v2398_v58, %v2393_v53  ;;  %v2412_v5 = vadd.f32 %v286_v60, %v151_v48  ;;  %v2043_v47 = vld [vmem:[#allocation8 + $0x2a0] ss:$12 sps:$4 sm:$0xff]   ;;  %v2045_v48 = vld [vmem:[#allocation8 + $0x2a4] ss:$12 sps:$4 sm:$0xff]   ;;  %v2060_v60 = vld [vmem:[#allocation8 + $0xdc] ss:$12 sps:$4 sm:$0xff]  }
 0x11e   :  { %v245_v2 = vpop.f32.mrf.mxu0  ;;  %v288_v3 = vpop.f32.mrf.mxu1  ;;  %v304_v14 = vmul.f32 %v2408_v1, %v2408_v1  ;;  %1185 = vmatprep.subr.bf16.mxu1 %v2045_v48  ;;  %v2055_v59 = vld [vmem:[#allocation8 + $0x270] ss:$12 sps:$4 sm:$0xff]   ;;  %1147 = vmatpush2.bf16.msra.mxu0 %v2052_v57 }
 0x11f   :  { %v2414_v6 = vadd.f32 %v245_v2, %v147_v50  ;;  %v292_v7 = vadd.f32 %v291_v63, %v2395_v54  ;;  %v309_v8 = vadd.f32 %v302_v61, %v301_v0  ;;  %v305_v9 = vmul.f32 %v2402_v62, %v2402_v62  ;;  %v2051_v50 = vld [vmem:[#allocation8 + $0x28c] ss:$12 sps:$4 sm:$0xff]   ;;  %1186 = vmatpush2.bf16.msra.mxu1 %v2043_v47  ;;  %v2063_v61 = vld [vmem:[#allocation8 + $0x25c] ss:$12 sps:$4 sm:$0xff]   ;;  %v2066_v2 = vld [vmem:[#allocation8 + $0xc4] ss:$12 sps:$4 sm:$0xff]  }
 0x120   :  { %v2423_v12 = vadd.f32 %v288_v3, %v155_v56  ;;  %v307_v16 = vmul.f32 %v2412_v5, %v2412_v5  ;;  %1187 = vmatprep.subr.bf16.mxu1 %v2051_v50  ;;  %v2057_v56 = vld [vmem:[#allocation8 + $0x274] ss:$12 sps:$4 sm:$0xff]   ;;  %v2058_v63 = vld [vmem:[#allocation8 + $0xd8] ss:$12 sps:$4 sm:$0xff]   ;;  %1148 = vmatprep.subr.bf16.mxu0 %v2060_v60  ;;  %v416_v60 = vrot.slane %v396_v39, %v2448_v32 }
 0x121   :  { %v296_v10 = vadd.f32 %v2414_v6, %v2402_v62  ;;  %v306_v11 = vmul.f32 %v2414_v6, %v2414_v6  ;;  %v293_v13 = vadd.f32 %v292_v7, %v2408_v1  ;;  %v310_v15 = vadd.f32 %v309_v8, %v303_v4  ;;  %v2061_v0 = vld [vmem:[#allocation8 + $0x258] ss:$12 sps:$4 sm:$0xff]   ;;  %v2064_v4 = vld [vmem:[#allocation8 + $0xc0] ss:$12 sps:$4 sm:$0xff]   ;;  %v2070_v8 = vld [vmem:[#allocation8 + $0x170] ss:$12 sps:$4 sm:$0xff]  }
 0x122   :  { %v308_v21 = vmul.f32 %v2423_v12, %v2423_v12  ;;  %v2069_v3 = vld [vmem:[#allocation8 + $0x244] ss:$12 sps:$4 sm:$0xff]   ;;  %1149 = vmatpush2.bf16.msra.mxu0 %v2058_v63  ;;  %v2067_v7 = vld [vmem:[#allocation8 + $0x240] ss:$12 sps:$4 sm:$0xff]  }
 0x123   :  { %v297_v17 = vadd.f32 %v296_v10, %v2412_v5  ;;  %v314_v18 = vadd.f32 %v306_v11, %v305_v9  ;;  %294 = vadd.xlane.f32.xlu0 %v293_v13  ;;  %v311_v19 = vadd.f32 %v310_v15, %v304_v14  ;;  %1188 = vmatpush2.bf16.msra.mxu1 %v2049_v52  ;;  %v2071_v9 = vld [vmem:[#allocation8 + $0x2f0] ss:$12 sps:$4 sm:$0xff]   ;;  %v2077_v39 = vld [vmem:[#allocation8 + $0x218] ss:$12 sps:$4 sm:$0xff]  }
 0x124   :  { %1189 = vmatprep.subr.bf16.mxu1 %v2057_v56  ;;  %1150 = vmatprep.subr.bf16.mxu0 %v2066_v2 }
 0x125   :  { %v298_v20 = vadd.f32 %v297_v17, %v2423_v12  ;;  %v315_v22 = vadd.f32 %v314_v18, %v307_v16  ;;  %312 = vadd.xlane.f32.xlu1 %v311_v19 }
 0x126   :  { %1151 = vmatpush2.bf16.msra.mxu0 %v2064_v4 }
 0x127   :  { %v316_v23 = vadd.f32 %v315_v22, %v308_v21  ;;  %299 = vadd.xlane.f32.xlu0 %v298_v20  ;;  %1190 = vmatpush2.bf16.msra.mxu1 %v2055_v59  ;;  %v428_v59 = vrot.slane %v408_v38, %v2448_v32  ;;  %v2075_v38 = vld [vmem:[#allocation8 + $0x2d8] ss:$12 sps:$4 sm:$0xff]  }
 0x128   :  { %1191 = vmatprep.subr.bf16.mxu1 %v2063_v61  ;;  %1848 = vmatprep.subr.bf16.mxu0 %v2070_v8 }
 0x129   :  { %317 = vadd.xlane.f32.xlu1 %v316_v23 }
 0x12b   :  { %1192 = vmatpush2.bf16.msra.mxu1 %v2061_v0 }
 0x12c   :  { %1193 = vmatprep.subr.bf16.mxu1 %v2069_v3 }
 0x12f   :  { %1194 = vmatpush2.bf16.msra.mxu1 %v2067_v7 }
 0x130   :  { %1870 = vmatprep.subr.bf16.mxu1 %v2071_v9 }
 0x1ac   :  { %v295_v10 = vpop.xlane.xlu0 %294 }
 0x1ad   :  { %v319_v11 = vmul.f32 0.0025, %v295_v10 }
 0x1ae   :  { %v313_v13 = vpop.xlane.xlu1 %312 }
 0x1af   :  { %v321_v14 = vmul.f32 0.0025, %v313_v13  ;;  %v323_v15 = vmul.f32 %v319_v11, %v319_v11  ;;  %v329_v47 = vsub.f32 %v2393_v53, %v319_v11  ;;  %v331_v48 = vsub.f32 %v2395_v54, %v319_v11 }
 0x1b0   :  { %v300_v16 = vpop.xlane.xlu0 %299  ;;  %v330_v49 = vsub.f32 %v2398_v58, %v319_v11  ;;  %v332_v50 = vsub.f32 %v2408_v1, %v319_v11 }
 0x1b1   :  { %v325_v17 = vsub.f32 %v321_v14, %v323_v15  ;;  %v320_v18 = vmul.f32 0.0025, %v300_v16 }
 0x1b2   :  { %v318_v19 = vpop.xlane.xlu1 %317 }
 0x1b3   :  { %v327_v20 = vmax.f32 %v325_v17, 0.0  ;;  %v322_v21 = vmul.f32 0.0025, %v318_v19  ;;  %v324_v22 = vmul.f32 %v320_v18, %v320_v18  ;;  %v333_v58 = vsub.f32 %v2402_v62, %v320_v18 }
 0x1b4   :  { %v335_v1 = vsub.f32 %v2412_v5, %v320_v18  ;;  %v334_v0 = vsub.f32 %v2414_v6, %v320_v18  ;;  %v336_v2 = vsub.f32 %v2423_v12, %v320_v18 }
 0x1b5   :  { %v337_v23 = vadd.f32 1e-05, %v327_v20  ;;  %v326_v24 = vsub.f32 %v322_v21, %v324_v22 }
 0x1b7   :  { %2126 = vrsqrt.f32 %v337_v23  ;;  %v328_v25 = vmax.f32 %v326_v24, 0.0 }
 0x1b9   :  { %v338_v27 = vadd.f32 1e-05, %v328_v25 }
 0x1bb   :  { %2128 = vrsqrt.f32 %v338_v27 }
 0x1c4   :  { %v2127_v51 = vpop.eup %2126 }
 0x1c5   :  { %v342_v52 = vmul.f32 %v2127_v51, %v330_v49  ;;  %v344_v55 = vmul.f32 %v2127_v51, %v332_v50  ;;  %v341_v56 = vmul.f32 %v2127_v51, %v329_v47  ;;  %v343_v57 = vmul.f32 %v2127_v51, %v331_v48  ;;  %v2080_v47 = vld [vmem:[#allocation8 + $0x80] ss:$12 sps:$4 sm:$0xff]   ;;  %v2082_v49 = vld [vmem:[#allocation8 + $0x128] ss:$12 sps:$4 sm:$0xff]  }
 0x1c6   :  { %v2081_v48 = vld [vmem:[#allocation8 + $0x200] ss:$12 sps:$4 sm:$0xff]   ;;  %v2083_v50 = vld [vmem:[#allocation8 + $0x2a8] ss:$12 sps:$4 sm:$0xff]  }
 0x1c7   :  { %v386_v53 = vmul.f32 %v376_v35, %v342_v52  ;;  %v388_v61 = vmul.f32 %v384_v37, %v344_v55  ;;  %v385_v54 = vmul.f32 %v372_v44, %v341_v56  ;;  %v387_v63 = vmul.f32 %v380_v45, %v343_v57  ;;  %v2084_v51 = vld [vmem:[#allocation8 + $0x68] ss:$12 sps:$4 sm:$0xff]   ;;  %v2086_v55 = vld [vmem:[#allocation8 + $0x110] ss:$12 sps:$4 sm:$0xff]  }
 0x1c8   :  { %v2129_v3 = vpop.eup %2128  ;;  %v2085_v52 = vld [vmem:[#allocation8 + $0x1e8] ss:$12 sps:$4 sm:$0xff]   ;;  %v2087_v56 = vld [vmem:[#allocation8 + $0x290] ss:$12 sps:$4 sm:$0xff]  }
 0x1c9   :  { %v346_v4 = vmul.f32 %v2129_v3, %v334_v0  ;;  %v348_v7 = vmul.f32 %v2129_v3, %v336_v2  ;;  %v345_v8 = vmul.f32 %v2129_v3, %v333_v58  ;;  %v347_v9 = vmul.f32 %v2129_v3, %v335_v1  ;;  %v2088_v57 = vld [vmem:[#allocation8 + $0x50] ss:$12 sps:$4 sm:$0xff]   ;;  %v2097_v58 = vld [vmem:[#allocation8 + $0x1a0] ss:$12 sps:$4 sm:$0xff]   ;;  %v2098_v1 = vld [vmem:[#allocation8 + $0xc8] ss:$12 sps:$4 sm:$0xff]  }
 0x1ca   :  { %v430_v10 = vadd.f32 %v420_v41, %v386_v53  ;;  %v432_v11 = vadd.f32 %v428_v59, %v388_v61  ;;  %v429_v13 = vadd.f32 %v416_v60, %v385_v54  ;;  %v431_v14 = vadd.f32 %v424_v42, %v387_v63  ;;  %v2093_v53 = vld [vmem:[#allocation8 + $0x1b8] ss:$12 sps:$4 sm:$0xff]   ;;  %v2094_v61 = vld [vmem:[#allocation8 + $0xe0] ss:$12 sps:$4 sm:$0xff]   ;;  %v2099_v0 = vld [vmem:[#allocation8 + $0x248] ss:$12 sps:$4 sm:$0xff]  }
 0x1cb   :  { %v390_v15 = vmul.f32 %v376_v35, %v346_v4  ;;  %v392_v16 = vmul.f32 %v384_v37, %v348_v7  ;;  %v389_v17 = vmul.f32 %v372_v44, %v345_v8  ;;  %v391_v19 = vmul.f32 %v380_v45, %v347_v9  ;;  %v2072_v35 = vld [vmem:[#allocation8 + $0xb0] ss:$12 sps:$4 sm:$0xff]   ;;  %v2074_v37 = vld [vmem:[#allocation8 + $0x158] ss:$12 sps:$4 sm:$0xff]   ;;  %v2078_v45 = vld [vmem:[#allocation8 + $0x140] ss:$12 sps:$4 sm:$0xff]  }
 0x1cc   :  { %v438_v6 = vmax.f32 %v430_v10, 0.0  ;;  %v440_v22 = vmax.f32 %v432_v11, 0.0  ;;  %v437_v12 = vmax.f32 %v429_v13, 0.0  ;;  %v439_v18 = vmax.f32 %v431_v14, 0.0  ;;  %v2076_v44 = vld [vmem:[#allocation8 + $0x98] ss:$12 sps:$4 sm:$0xff]  }
 0x1cd   :  { %v434_v62 = vadd.f32 %v420_v41, %v390_v15  ;;  %v436_v20 = vadd.f32 %v428_v59, %v392_v16  ;;  %v433_v5 = vadd.f32 %v416_v60, %v389_v17  ;;  %v435_v21 = vadd.f32 %v424_v42, %v391_v19  ;;  %v2089_v41 = vld [vmem:[#allocation8 + $0x1d0] ss:$12 sps:$4 sm:$0xff]   ;;  %v2090_v59 = vld [vmem:[#allocation8 + $0xf8] ss:$12 sps:$4 sm:$0xff]   ;;  %v2095_v54 = vld [vmem:[#allocation8 + $0x260] ss:$12 sps:$4 sm:$0xff]  }
 0x1ce   :  { %v2091_v60 = vld [vmem:[#allocation8 + $0x278] ss:$12 sps:$4 sm:$0xff]   ;;  %v2096_v63 = vld [vmem:[#allocation8 + $0x20] ss:$12 sps:$4 sm:$0xff]   ;;  %v2100_v2 = vld [vmem:[#allocation8 + $0x8] ss:$12 sps:$4 sm:$0xff]  }
 0x1cf   :  { %v442_v23 = vmax.f32 %v434_v62, 0.0  ;;  %v444_v24 = vmax.f32 %v436_v20, 0.0  ;;  %v441_v25 = vmax.f32 %v433_v5, 0.0  ;;  %v443_v27 = vmax.f32 %v435_v21, 0.0  ;;  %v2092_v42 = vld [vmem:[#allocation8 + $0x38] ss:$12 sps:$4 sm:$0xff]  }
 0x1d0   :  { %v2101_v3 = vld [vmem:[#allocation8 + $0x188] ss:$12 sps:$4 sm:$0xff]   ;;  %v2486_v8 = vld [vmem:[#allocation10] sm:$0x77] }
 0x1d1   :  { %v448_v29 = vpack.c.bf16 %v442_v23, %v438_v6  ;;  %v450_v31 = vpack.c.bf16 %v444_v24, %v440_v22  ;;  %v2478_v33 = vpack.c.bf16 %v441_v25, %v437_v12  ;;  %v2480_v34 = vpack.c.bf16 %v443_v27, %v439_v18  ;;  %v2493_v17 = vld [vmem:[#allocation10 + $0x8] sm:$0x7] }
 0x1d2   :  { %v588_v9 = vrot.slane %v2486_v8, %v2380_v43  ;;  %v584_v13 = vrot.slane %v2486_v8, %v2373_v40  ;;  %v592_v62 = vrot.slane %v2493_v17, %v2373_v40 }
 0x1d3   :  { %1152 = vmatprep.mubr.bf16.mxu0 %v448_v29  ;;  %1195 = vmatprep.mubr.bf16.mxu1 %v450_v31 }
 0x1d4   :  { %1153 = vmatmul.mubr.bf16.vlgmr.msra.gmra.mxu0 %v2478_v33  ;;  %1196 = vmatmul.mubr.bf16.vlgmr.msra.gmra.mxu1 %v2480_v34  ;;  %v603_v14 = vrot.slane %v588_v9, %v2373_v40  ;;  %v599_v19 = vrot.slane %v584_v13, %v2373_v40  ;;  %v607_v12 = vrot.slane %v592_v62, %v2373_v40  ;;  %v2109_v9 = vld [vmem:[#allocation11 + $0xa8] sm:$0xff]   ;;  %v2112_v13 = vld [vmem:[#allocation11 + $0xa0] sm:$0xff]   ;;  %v2117_v62 = vld [vmem:[#allocation11 + $0x50] sm:$0xff]  }
 0x1d5   :  { %1849 = vmatpush3.bf16.msra.mxu0 %v2072_v35  ;;  %1871 = vmatpush3.bf16.msra.mxu1 %v2073_v36 }
 0x1d6   :  { %1238 = vmatprep.mubr.bf16.mxu0 %v448_v29  ;;  %1279 = vmatprep.mubr.bf16.mxu1 %v450_v31 }
 0x1d7   :  { %1850 = vmatprep.subr.bf16.mxu0 %v2074_v37  ;;  %1872 = vmatprep.subr.bf16.mxu1 %v2075_v38 }
 0x1d9   :  { %1851 = vmatpush3.bf16.msra.mxu0 %v2076_v44  ;;  %1873 = vmatpush3.bf16.msra.mxu1 %v2077_v39 }
 0x1da   :  { %1852 = vmatprep.subr.bf16.mxu0 %v2078_v45  ;;  %1874 = vmatprep.subr.bf16.mxu1 %v2079_v46 }
 0x1dd   :  { %1853 = vmatpush3.bf16.msra.mxu0 %v2080_v47  ;;  %1875 = vmatpush3.bf16.msra.mxu1 %v2081_v48 }
 0x1de   :  { %1854 = vmatprep.subr.bf16.mxu0 %v2082_v49  ;;  %1876 = vmatprep.subr.bf16.mxu1 %v2083_v50 }
 0x1e1   :  { %1855 = vmatpush3.bf16.msra.mxu0 %v2084_v51  ;;  %1877 = vmatpush3.bf16.msra.mxu1 %v2085_v52 }
 0x1e2   :  { %1856 = vmatprep.subr.bf16.mxu0 %v2086_v55  ;;  %1878 = vmatprep.subr.bf16.mxu1 %v2087_v56 }
 0x1e5   :  { %1857 = vmatpush3.bf16.msra.mxu0 %v2088_v57  ;;  %1879 = vmatpush3.bf16.msra.mxu1 %v2089_v41 }
 0x1e6   :  { %1858 = vmatprep.subr.bf16.mxu0 %v2090_v59  ;;  %1880 = vmatprep.subr.bf16.mxu1 %v2091_v60 }
 0x1e9   :  { %1859 = vmatpush3.bf16.msra.mxu0 %v2092_v42  ;;  %1881 = vmatpush3.bf16.msra.mxu1 %v2093_v53 }
 0x1ea   :  { %1860 = vmatprep.subr.bf16.mxu0 %v2094_v61  ;;  %1882 = vmatprep.subr.bf16.mxu1 %v2095_v54 }
 0x1ed   :  { %1861 = vmatpush3.bf16.msra.mxu0 %v2096_v63  ;;  %1883 = vmatpush3.bf16.msra.mxu1 %v2097_v58  ;;  %v2102_v63 = vld [vmem:[#allocation11 + $0x78] sm:$0xff]  }
 0x1ee   :  { %1862 = vmatprep.subr.bf16.mxu0 %v2098_v1  ;;  %1884 = vmatprep.subr.bf16.mxu1 %v2099_v0  ;;  %v2103_v58 = vld [vmem:[#allocation11 + $0xb8] sm:$0xff]   ;;  %v2301_v1 = vmov 0.0  }
 0x1ef   :  { %v2104_v0 = vld [vmem:[#allocation11 + $0x38] sm:$0xff]  }
 0x1f1   :  { %1863 = vmatpush3.bf16.msra.mxu0 %v2100_v2  ;;  %1885 = vmatpush3.bf16.msra.mxu1 %v2101_v3  ;;  %v2105_v2 = vld [vmem:[#allocation11 + $0x70] sm:$0xff]  }
 0x1f2   :  { %1923 = vmatprep.subr.bf16.mxu1 %v2301_v1  ;;  %1892 = vmatprep.subr.bf16.mxu0 %v2102_v63  ;;  %v2106_v3 = vld [vmem:[#allocation11 + $0xb0] sm:$0xff]   ;;  %v1372_v63 = vrot.slane %v2486_v8, %v2448_v32 }
 0x1f4   :  { %1239 = vmatmul.mubr.bf16.vlgmr.msra.gmra.mxu0 %v2478_v33  ;;  %1280 = vmatmul.mubr.bf16.vlgmr.msra.gmra.mxu1 %v2480_v34 }
 0x1f5   :  { %1924 = vmatpush3.bf16.msra.mxu1 %v2103_v58  ;;  %1893 = vmatpush3.bf16.msra.mxu0 %v2104_v0 }
 0x1f6   :  { %1925 = vmatprep.subr.bf16.mxu1 %v2301_v1  ;;  %1894 = vmatprep.subr.bf16.mxu0 %v2105_v2 }
 0x1f7   :  { %1939 = vmatprep.mubr.msk.bf16.mxu1 %vm2302_vm1, %v2301_v1 }
 0x1f9   :  { %1926 = vmatpush3.bf16.msra.mxu1 %v2106_v3 }
 0x1fa   :  { %1927 = vmatprep.subr.bf16.mxu1 %v2301_v1 }
 0x1fd   :  { %1928 = vmatpush3.bf16.msra.mxu1 %v2109_v9 }
 0x1fe   :  { %1929 = vmatprep.subr.bf16.mxu1 %v2301_v1 }
 0x201   :  { %1930 = vmatpush3.bf16.msra.mxu1 %v2112_v13 }
 0x202   :  { %1931 = vmatprep.subr.bf16.mxu1 %v2301_v1 }
 0x294   :  { %v1154_v4 = vpop.f32.mrf.mxu0  ;;  %v1197_v7 = vpop.f32.mrf.mxu1 }
 0x295   :  { %v1155_v43 = vadd.f32 %v1154_v4, %v599_v19  ;;  %v2107_v4 = vld [vmem:[#allocation11 + $0x30] sm:$0xff]  }
 0x296   :  { %v1156_v10 = vpop.f32.mrf.mxu0  ;;  %v1199_v11 = vpop.f32.mrf.mxu1  ;;  %1895 = vmatpush3.bf16.msra.mxu0 %v2107_v4 }
 0x297   :  { %v1157_v20 = vadd.f32 %v1156_v10, %v603_v14  ;;  %v2501_v29 = vadd.f32 %v1197_v7, %v1155_v43  ;;  %v2108_v7 = vld [vmem:[#allocation11 + $0x68] sm:$0xff]  }
 0x298   :  { %v1158_v15 = vpop.f32.mrf.mxu0  ;;  %v1201_v16 = vpop.f32.mrf.mxu1  ;;  %v2110_v10 = vld [vmem:[#allocation11 + $0x28] sm:$0xff]   ;;  %1896 = vmatprep.subr.bf16.mxu0 %v2108_v7  ;;  %v1387_v7 = vrot.slane %v1372_v63, %v2448_v32 }
 0x299   :  { %v2499_v18 = vadd.f32 %v1199_v11, %v1157_v20  ;;  %v1159_v31 = vadd.f32 %v1158_v15, %v599_v19  ;;  %v1296_v47 = vmul.f32 %v2501_v29, %v2501_v29  ;;  %v2111_v11 = vld [vmem:[#allocation11 + $0x60] sm:$0xff]   ;;  %v2114_v15 = vld [vmem:[#allocation11 + $0x58] sm:$0xff]   ;;  %v2118_v20 = vld [vmem:[#allocation11 + $0x90] sm:$0xff]  }
 0x29a   :  { %v1160_v5 = vpop.f32.mrf.mxu0  ;;  %v1203_v21 = vpop.f32.mrf.mxu1  ;;  %1897 = vmatpush3.bf16.msra.mxu0 %v2110_v10  ;;  %v2116_v19 = vld [vmem:[#allocation11 + $0x18] sm:$0xff]   ;;  %v2121_v43 = vld [vmem:[#allocation11 + $0x88] sm:$0xff]  }
 0x29b   :  { %v1161_v25 = vadd.f32 %v1160_v5, %v603_v14  ;;  %v1297_v37 = vmul.f32 %v2499_v18, %v2499_v18  ;;  %v1288_v46 = vadd.f32 %v2499_v18, %v2501_v29  ;;  %v2513_v48 = vadd.f32 %v1201_v16, %v1159_v31  ;;  %v2113_v14 = vld [vmem:[#allocation11 + $0x20] sm:$0xff]   ;;  %1898 = vmatprep.subr.bf16.mxu0 %v2111_v11  ;;  %v2115_v16 = vld [vmem:[#allocation11 + $0x98] sm:$0xff]   ;;  %v2119_v5 = vld [vmem:[#allocation11 + $0x10] sm:$0xff]  }
 0x29c   :  { %1932 = vmatpush3.bf16.msra.mxu1 %v2115_v16 }
 0x29d   :  { %v2505_v39 = vadd.f32 %v1203_v21, %v1161_v25  ;;  %v1302_v41 = vadd.f32 %v1297_v37, %v1296_v47  ;;  %v1299_v59 = vmul.f32 %v2513_v48, %v2513_v48  ;;  %1933 = vmatprep.subr.bf16.mxu1 %v2301_v1  ;;  %v2120_v21 = vld [vmem:[#allocation11 + $0x48] sm:$0xff]  }
 0x29e   :  { %1899 = vmatpush3.bf16.msra.mxu0 %v2113_v14 }
 0x29f   :  { %v1300_v55 = vmul.f32 %v2505_v39, %v2505_v39  ;;  %v1292_v57 = vadd.f32 %v2505_v39, %v2513_v48  ;;  %1900 = vmatprep.subr.bf16.mxu0 %v2114_v15 }
 0x2a0   :  { %1934 = vmatpush3.bf16.msra.mxu1 %v2118_v20 }
 0x2a1   :  { %v1306_v61 = vadd.f32 %v1300_v55, %v1299_v59  ;;  %1935 = vmatprep.subr.bf16.mxu1 %v2301_v1  ;;  %v1339_v55 = vrot.slane %v2486_v8, %v2438_v28  ;;  %v1376_v59 = vrot.slane %v2486_v8, %v2443_v30 }
 0x2a2   :  { %1901 = vmatpush3.bf16.msra.mxu0 %v2116_v19 }
 0x2a3   :  { %1902 = vmatprep.subr.bf16.mxu0 %v2117_v62  ;;  %v1391_v0 = vrot.slane %v1376_v59, %v2448_v32 }
 0x2a4   :  { %1936 = vmatpush3.bf16.msra.mxu1 %v2121_v43 }
 0x2a5   :  { %1937 = vmatprep.subr.bf16.mxu1 %v2301_v1 }
 0x2a6   :  { %1903 = vmatpush3.bf16.msra.mxu0 %v2119_v5 }
 0x2a7   :  { %1904 = vmatprep.subr.bf16.mxu0 %v2120_v21 }
 0x2b4   :  { %v1864_v6 = vpop.f32.mrf.mxu0  ;;  %v1886_v22 = vpop.f32.mrf.mxu1 }
 0x2b6   :  { %v1865_v23 = vpop.f32.mrf.mxu0  ;;  %v1887_v24 = vpop.f32.mrf.mxu1 }
 0x2b7   :  { %v1866_v27 = vadd.f32 %v1865_v23, %v1864_v6  ;;  %v1888_v36 = vadd.f32 %v1887_v24, %v1886_v22  ;;  %v2122_v6 = vld [vmem:[#allocation11 + $0x8] sm:$0xff]   ;;  %v2123_v22 = vld [vmem:[#allocation11 + $0x40] sm:$0xff]  }
 0x2b8   :  { %v1867_v33 = vpop.f32.mrf.mxu0  ;;  %v1889_v34 = vpop.f32.mrf.mxu1  ;;  %1905 = vmatpush3.bf16.msra.mxu0 %v2122_v6  ;;  %v2125_v23 = vld [vmem:[#allocation11] sm:$0xff]  }
 0x2b9   :  { %v1241_v35 = vadd.f32 %v1866_v27, %v607_v12  ;;  %1906 = vmatprep.subr.bf16.mxu0 %v2123_v22 }
 0x2ba   :  { %v1868_v38 = vpop.f32.mrf.mxu0  ;;  %v1890_v44 = vpop.f32.mrf.mxu1 }
 0x2bb   :  { %v2507_v40 = vadd.f32 %v1888_v36, %v1241_v35  ;;  %v1869_v45 = vadd.f32 %v1868_v38, %v1867_v33  ;;  %v1891_v50 = vadd.f32 %v1890_v44, %v1889_v34 }
 0x2bc   :  { %1907 = vmatpush3.bf16.msra.mxu0 %v2125_v23 }
 0x2bd   :  { %v1244_v49 = vadd.f32 %v1869_v45, %v607_v12  ;;  %v1289_v51 = vadd.f32 %v1288_v46, %v2507_v40  ;;  %v1298_v52 = vmul.f32 %v2507_v40, %v2507_v40  ;;  %v2124_v12 = vld [vmem:[#allocation11 + $0x80] sm:$0xff]  }
 0x2be   :  { %1938 = vmatpush3.bf16.msra.mxu1 %v2124_v12 }
 0x2bf   :  { %v2520_v56 = vadd.f32 %v1891_v50, %v1244_v49  ;;  %1290 = vadd.xlane.f32.xlu0 %v1289_v51  ;;  %v1303_v42 = vadd.f32 %v1302_v41, %v1298_v52  ;;  %v1347_v51 = vrot.slane %v2493_v17, %v2438_v28  ;;  %v1343_v52 = vrot.slane %v2486_v8, %v2435_v26 }
 0x2c0   :  { %v1380_v41 = vrot.slane %v2493_v17, %v2448_v32 }
 0x2c1   :  { %v1293_v60 = vadd.f32 %v1292_v57, %v2520_v56  ;;  %v1301_v53 = vmul.f32 %v2520_v56, %v2520_v56  ;;  %v1362_v57 = vrot.slane %v1347_v51, %v2438_v28 }
 0x2c2   :  { %v1395_v30 = vrot.slane %v1380_v41, %v2448_v32 }
 0x2c3   :  { %1294 = vadd.xlane.f32.xlu1 %v1293_v60  ;;  %1304 = vadd.xlane.f32.xlu0 %v1303_v42  ;;  %v1307_v54 = vadd.f32 %v1306_v61, %v1301_v53  ;;  %v1358_v61 = vrot.slane %v1343_v52, %v2438_v28 }
 0x2c7   :  { %1308 = vadd.xlane.f32.xlu1 %v1307_v54  ;;  %v1354_v54 = vrot.slane %v1339_v55, %v2438_v28 }
 0x348   :  { %v1291_v24 = vpop.xlane.xlu0 %1290 }
 0x349   :  { %v1310_v25 = vmul.f32 0.0033333334, %v1291_v24 }
 0x34b   :  { %v1314_v34 = vmul.f32 %v1310_v25, %v1310_v25  ;;  %v1320_v60 = vsub.f32 %v2501_v29, %v1310_v25  ;;  %v1321_v42 = vsub.f32 %v2499_v18, %v1310_v25  ;;  %v1322_v53 = vsub.f32 %v2507_v40, %v1310_v25 }
 0x34c   :  { %v1295_v27 = vpop.xlane.xlu1 %1294  ;;  %v1305_v31 = vpop.xlane.xlu0 %1304 }
 0x34d   :  { %v1311_v33 = vmul.f32 0.0033333334, %v1295_v27  ;;  %v1312_v35 = vmul.f32 0.0033333334, %v1305_v31  ;;  %v1823_v27 = vld [vmem:[%s2565_s6] ss:$0 sm:$0xff] }
 0x34e   :  { %s2258_s6 = scalar_lea.vmem %s1702_s11, 256 }
 0x34f   :  { %v1316_v36 = vsub.f32 %v1312_v35, %v1314_v34  ;;  %v1315_v44 = vmul.f32 %v1311_v33, %v1311_v33  ;;  %v1324_v29 = vsub.f32 %v2505_v39, %v1311_v33  ;;  %v1325_v18 = vsub.f32 %v2520_v56, %v1311_v33  ;;  %p2259_p2 = scmp.ne.s32.totalorder %s1702_s11, %s2258_s6  ;;  %p2264_p4 = scmp.lt.s32.totalorder %s2258_s6, %s2258_s6 }
 0x350   :  { %v1309_v37 = vpop.xlane.xlu1 %1308  ;;  %v1323_v4 = vsub.f32 %v2513_v48, %v1311_v33 }
 0x351   :  { %v1318_v38 = vmax.f32 %v1316_v36, 0.0  ;;  %v1313_v45 = vmul.f32 0.0033333334, %v1309_v37  ;;  %p2265_p5 = por %p2264_p4, %p2263_p3 }
 0x353   :  { %v1326_v46 = vadd.f32 1e-05, %v1318_v38  ;;  %v1317_v47 = vsub.f32 %v1313_v45, %v1315_v44  ;;  %p2266_p6 = pnand %p2265_p5, %p2259_p2 }
 0x355   :  { %2130 = vrsqrt.f32 %v1326_v46  ;;  %v1319_v49 = vmax.f32 %v1317_v47, 0.0 }
 0x357   :  { %v1327_v50 = vadd.f32 1e-05, %v1319_v49 }
 0x359   :  { %2132 = vrsqrt.f32 %v1327_v50 }
 0x362   :  { %v2131_v26 = vpop.eup %2130 }
 0x363   :  { %v1331_v58 = vmul.f32 %v2131_v26, %v1321_v42  ;;  %v1332_v1 = vmul.f32 %v2131_v26, %v1322_v53  ;;  %v1330_v17 = vmul.f32 %v2131_v26, %v1320_v60 }
 0x365   :  { %v1364_v40 = vmul.f32 %v1358_v61, %v1331_v58  ;;  %v1365_v2 = vmul.f32 %v1362_v57, %v1332_v1  ;;  %v1363_v28 = vmul.f32 %v1354_v54, %v1330_v17 }
 0x366   :  { %v2133_v3 = vpop.eup %2132 }
 0x367   :  { %v1334_v8 = vmul.f32 %v2133_v3, %v1324_v29  ;;  %v1335_v9 = vmul.f32 %v2133_v3, %v1325_v18  ;;  %v1333_v10 = vmul.f32 %v2133_v3, %v1323_v4  ;;  %v1397_v13 = vadd.f32 %v1391_v0, %v1364_v40 }
 0x368   :  { %v1398_v15 = vadd.f32 %v1395_v30, %v1365_v2  ;;  %v1396_v19 = vadd.f32 %v1387_v7, %v1363_v28 }
 0x369   :  { %v1367_v11 = vmul.f32 %v1358_v61, %v1334_v8  ;;  %v1368_v14 = vmul.f32 %v1362_v57, %v1335_v9  ;;  %v1366_v16 = vmul.f32 %v1354_v54, %v1333_v10  ;;  %v1403_v20 = vmax.f32 %v1397_v13, 0.0 }
 0x36a   :  { %v1404_v21 = vmax.f32 %v1398_v15, 0.0  ;;  %v1402_v48 = vmax.f32 %v1396_v19, 0.0 }
 0x36b   :  { %v1400_v39 = vadd.f32 %v1391_v0, %v1367_v11  ;;  %v1401_v62 = vadd.f32 %v1395_v30, %v1368_v14  ;;  %v1399_v56 = vadd.f32 %v1387_v7, %v1366_v16 }
 0x36d   :  { %v1406_v5 = vmax.f32 %v1400_v39, 0.0  ;;  %v1407_v43 = vmax.f32 %v1401_v62, 0.0  ;;  %v1405_v6 = vmax.f32 %v1399_v56, 0.0 }
 0x36f   :  { %v1409_v22 = vpack.c.bf16 %v1406_v5, %v1403_v20  ;;  %v1410_v32 = vpack.c.bf16 %v1407_v43, %v1404_v21  ;;  %v1408_v12 = vpack.c.bf16 %v1405_v6, %v1402_v48 }
 0x371   :  { %1642 = vmatprep.mubr.bf16.mxu0 %v1409_v22  ;;  %1940 = vmatmul.mubr.bf16.vlgmr.msra.gmra.mxu1 %v1410_v32 }
 0x372   :  { %1643 = vmatmul.mubr.bf16.vlgmr.msra.gmra.mxu0 %v1408_v12 }
 0x431   :  { %v1685_v23 = vpop.f32.mrf.mxu1 }
 0x432   :  { %v1908_v24 = vpop.f32.mrf.mxu0 }
 0x433   :  { %v1941_v25 = vpop.f32.mrf.mxu1 }
 0x434   :  { %v1909_v31 = vpop.f32.mrf.mxu0 }
 0x435   :  { %v1910_v33 = vadd.f32 %v1909_v31, %v1908_v24  ;;  %v1688_v34 = vpop.f32.mrf.mxu1 }
 0x436   :  { %v1911_v35 = vpop.f32.mrf.mxu0 }
 0x437   :  { %v1645_v36 = vadd.f32 %v1910_v33, %v1823_v27  ;;  %v1942_v37 = vpop.f32.mrf.mxu1 }
 0x438   :  { %v1912_v38 = vpop.f32.mrf.mxu0 }
 0x439   :  { %v1686_v44 = vadd.f32 %v1685_v23, %v1645_v36  ;;  %v1913_v45 = vadd.f32 %v1912_v38, %v1911_v35 }
 0x43b   :  { %2134 = vtanh.f32 %v1686_v44  ;;  %v1648_v46 = vadd.f32 %v1913_v45, %v1823_v27 }
 0x43d   :  { %v1689_v47 = vadd.f32 %v1688_v34, %v1648_v46 }
 0x43f   :  { %2136 = vtanh.f32 %v1689_v47 }
 0x448   :  { %v2135_v49 = vpop.eup %2134 }
 0x449   :  { %1694 = vst [vmem:[#allocation13] sm:$0xff] %v2135_v49 }
 0x44c   :  { %v2137_v50 = vpop.eup %2136 }
 0x44d   :  { %1695 = vst [vmem:[#allocation13 + $0x8] sm:$0xff] %v2137_v50 }
 0x44e   :  { %2269 = shalt.err (!%p2266_p6)
}
 0x44f   :  { %s2304_s12 = smov 128   ;;  %s2305_s13 = smov 8  }
 0x450   :  { %1707 = dma.vmem_to_hbm [thread:$0]  %s1702_s11, 256, %s2566_s7, [#allocation4], %s2304_s12, %s2304_s12, %s2305_s13  }
 0x451   :  { %2286 = dma.done.wait [#allocation4], 256  }
 0x452   :  { %2287 = vsyncadd [#allocation4], 4294967040 }
 0x453   :  { %1711 = vsyncpa [#allocation3], 1 }
 0x454   :  { %1712 = vsyncpa [#allocation6], 1 }
 0x455   :  { %1713 = vsyncpa [#allocation9], 1 }
 0x456   :  { %1714 = vsyncpa [#allocation12], 1 }
 0x457   :  { %1715 = vsyncpa [#allocation4], 1 }

</bundles_post_ra>
